<compile_context>
chip_gen: v5e
topology: v5e:2x2
jax: 0.10.0
libtpu: 0.0.40
codegen_flags: <defaults>
</compile_context>

<pallas_src>
import jax
import jax.numpy as jnp
from jax.experimental import pallas as pl
from jax.experimental.pallas import tpu as pltpu

_MiB = 1024 * 1024


def _sigmoid_kernel(x_ref, o_ref):
    # HBM-bound elementwise op: the f32 cast + exp hide under DMA (EUP/VPU slack).
    x = x_ref[...]
    o_ref[...] = jax.nn.sigmoid(x.astype(jnp.float32)).astype(o_ref.dtype)


def _default_block_bytes():
    """Generation-tuned block size (per-step overhead vs. per-step DMA time)."""
    try:
        kind = jax.devices()[0].device_kind.lower()
    except Exception:
        return 4 * _MiB
    if "v5 lite" in kind or "v5e" in kind or "v5lite" in kind:
        return 2 * _MiB          # ~0.82 TB/s HBM: 2 MiB already amortizes overhead
    if "v6" in kind:
        return 4 * _MiB          # v6e: ~86% of HBM roofline at >= 4 MiB tiles
    if "7" in kind:
        return 8 * _MiB          # v7x: 3.2 TB/s HBM -> bigger tiles, still << 64 MiB VMEM
    return 4 * _MiB


def _sublane_multiple(itemsize):
    # Sub-32-bit dtypes pack along sublanes; keep row counts on the packed tile.
    return 8 * max(1, 4 // int(itemsize))


def _choose_tile_rows(rows, cols, itemsize, block_bytes, min_steps=4):
    """Pick block rows: ~block_bytes per block, multiple of the packed sublane tile."""
    sub = _sublane_multiple(itemsize)
    bytes_per_row = cols * itemsize
    tr = int(block_bytes // max(bytes_per_row, 1))
    tr = max(sub, tr - (tr % sub))
    if tr < rows:
        return tr
    # Whole array fits in one block: still try for >= min_steps grid steps so the
    # DMA pipeline has depth and v7x's two TensorCores (parallel axis) both work.
    for steps in range(min_steps, 1, -1):
        cand = rows // steps
        cand -= cand % sub
        if cand >= sub:
            return cand
    return rows                  # single full-extent block (allowed)


def sigmoid(x, *, block_bytes=None, donate_input=False):
    """Elementwise sigmoid matching torch.Tensor.sigmoid()."""
    orig_shape = x.shape
    dtype = x.dtype
    if not jnp.issubdtype(dtype, jnp.floating):
        raise TypeError(
            f"sigmoid: expected a floating dtype, got {dtype} "
            "(torch.Tensor.sigmoid rejects integer tensors)."
        )

    n = int(x.size)
    if n == 0:
        return x

    if block_bytes is None:
        block_bytes = _default_block_bytes()
    itemsize = jnp.dtype(dtype).itemsize

    # 4 double-buffered tiles + headroom; capped below v7x's 64 MiB physical VMEM.
    vmem_limit = int(min(48 * _MiB, max(32 * _MiB, 6 * block_bytes)))
    cparams = pltpu.CompilerParams(
        dimension_semantics=("parallel",),
        vmem_limit_bytes=vmem_limit,
    )
    cost = pl.CostEstimate(
        flops=4 * n, transcendentals=n, bytes_accessed=2 * n * itemsize
    )
    aliases = {0: 0} if donate_input else {}

    flat = x.reshape(-1)  # contiguous row-major -> free view

    # Lane-dense 2D path when a multiple-of-128 column count divides N exactly
    # (the common case: free reshape, unmasked full-lane vst everywhere).
    cols = next((c for c in (2048, 1024, 512, 256, 128) if n % c == 0), None)

    if cols is not None:
        rows = n // cols
        tr = _choose_tile_rows(rows, cols, itemsize, block_bytes)
        out = pl.pallas_call(
            _sigmoid_kernel,
            out_shape=jax.ShapeDtypeStruct((rows, cols), dtype),
            grid=(pl.cdiv(rows, tr),),
            in_specs=[pl.BlockSpec((tr, cols), lambda i: (i, 0))],
            out_specs=pl.BlockSpec((tr, cols), lambda i: (i, 0)),
            compiler_params=cparams,
            cost_estimate=cost,
            input_output_aliases=aliases,
        )(flat.reshape(rows, cols))
    else:
        # Rare fallback: N not divisible by 128. Stay 1-D, no jnp.pad / slice:
        # only the trailing partial block pays for masked stores.
        blk = block_bytes // itemsize
        quant = 128 * _sublane_multiple(itemsize)
        blk = max(quant, blk - (blk % quant))
        if blk >= n:
            blk = n              # single full-extent block (allowed)
        out = pl.pallas_call(
            _sigmoid_kernel,
            out_shape=jax.ShapeDtypeStruct((n,), dtype),
            grid=(pl.cdiv(n, blk),),
            in_specs=[pl.BlockSpec((blk,), lambda i: (i,))],
            out_specs=pl.BlockSpec((blk,), lambda i: (i,)),
            compiler_params=cparams,
            cost_estimate=cost,
            input_output_aliases=aliases,
        )(flat)

    return out.reshape(orig_shape)


if __name__ == "__main__":
    key = jax.random.PRNGKey(0)
    # Small NCHW-like input consistent with typical usage of the module.
    x = jax.random.normal(key, (2, 4, 16, 16), dtype=jnp.float32)

    out = jax.block_until_ready(sigmoid(x))
    ref = jax.nn.sigmoid(x)
    assert out.shape == x.shape and out.dtype == x.dtype
    assert jnp.allclose(out, ref, atol=1e-6, rtol=1e-5)

    # Exercise the pad-free path for element counts not divisible by 128.
    x2 = jax.random.normal(jax.random.PRNGKey(0), (2, 4, 12, 10), dtype=jnp.float32)
    out2 = jax.block_until_ready(sigmoid(x2))
    assert out2.shape == x2.shape and out2.dtype == x2.dtype
    assert jnp.allclose(out2, jax.nn.sigmoid(x2), atol=1e-6, rtol=1e-5)

    print("KERNEL_OK")
</pallas_src>

<mosaic_0001>
module attributes {stable_mosaic.version = 11 : i64} {
  func.func @_sigmoid_kernel(%arg0: i32, %arg1: memref<1x2048xf32, #tpu.memory_space<vmem>>, %arg2: memref<1x2048xf32, #tpu.memory_space<vmem>>) attributes {dimension_semantics = [#tpu.dimension_semantics<parallel>], iteration_bounds = array<i64: 1>, scalar_prefetch = 0 : i64, scratch_operands = 0 : i64, tpu.core_type = #tpu.core_type<tc>, window_params = [{transform_indices = @transform_0, window_bounds = array<i64: 1, 2048>}, {transform_indices = @transform_1, window_bounds = array<i64: 1, 2048>}]} {
    %c0 = arith.constant 0 : index
    %c0_0 = arith.constant 0 : index
    %0 = vector.load %arg1[%c0, %c0_0] : memref<1x2048xf32, #tpu.memory_space<vmem>>, vector<1x2048xf32>
    %1 = arith.negf %0 : vector<1x2048xf32>
    %2 = math.exp %1 : vector<1x2048xf32>
    %cst = arith.constant 1.000000e+00 : f32
    %3 = vector.broadcast %cst : f32 to vector<1x2048xf32>
    %4 = arith.addf %3, %2 : vector<1x2048xf32>
    %5 = arith.divf %3, %4 : vector<1x2048xf32>
    %c0_1 = arith.constant 0 : index
    %c0_2 = arith.constant 0 : index
    %6 = vector.load %arg2[%c0_1, %c0_2] : memref<1x2048xf32, #tpu.memory_space<vmem>>, vector<1x2048xf32>
    tpu.vector_store %arg2[%c0_1, %c0_2], %5 {strides = array<i32>} : memref<1x2048xf32, #tpu.memory_space<vmem>>, vector<1x2048xf32>,
    return
  }
  func.func @transform_0(%arg0: i32) -> (i32, i32) {
    %c0_i32 = arith.constant 0 : i32
    %c0_i32_0 = arith.constant 0 : i32
    return %arg0, %c0_i32 : i32, i32
  }
  func.func @transform_1(%arg0: i32) -> (i32, i32) {
    %c0_i32 = arith.constant 0 : i32
    %c0_i32_0 = arith.constant 0 : i32
    return %arg0, %c0_i32 : i32, i32
  }
}

</mosaic_0001>

<bundles_post_ra>
// kernel: tpu_custom_call.1
= control target key start
LH: loop header
LB: loop body
LE: loop exit
PB: predicated region body
PF: predicated region fallthrough
CT: control target
= control target key end

     0   :  { %6 = vsyncpa [#allocation3], 0  ;;  %s164_s0 = inlined_call_operand.hbm [shape: f32[1,2048], index: 0, kind: input, shape index: {}]   ;;  %s165_s1 = inlined_call_operand.hbm [shape: f32[1,2048], index: 1, kind: output, shape index: {}]  }
   0x1   :  { %7 = vsyncpa [#allocation4], 0  ;;  %s13_s8 = sshll.u32 %s164_s0, 4  ;;  %s146_s9 = smov [#allocation2]   ;;  %s14_s8 = int_to_ptr.hbm [resolvable:$true] %s13_s8 }
   0x2   :  { %s15_s10 = sshll.u32 %s146_s9, 4  ;;  %s16_s10 = int_to_ptr.vmem [resolvable:$true] %s15_s10 }
   0x3   :  { %18 = dma.hbm_to_vmem [thread:$0]  %s14_s8, 256, %s16_s10, [#allocation3]  }
   0x4   :  { %142 = dma.done.wait [#allocation3], 256  }
   0x5   :  { %143 = vsyncadd [#allocation3], 4294967040  ;;  %v23_v0 = vld [vmem:[#allocation2] sm:$0xff]  ;;  %v24_v1 = vld [vmem:[#allocation2 + $0x8] sm:$0xff]  ;;  %s147_s0 = smov [#allocation5]   ;;  %s72_s14 = sshll.u32 %s165_s1, 4  ;;  %s73_s14 = int_to_ptr.hbm [resolvable:$true] %s72_s14 }
   0x6   :  { %v82_v2 = vmul.f32 -1.442695, %v23_v0  ;;  %v83_v3 = vmul.f32 -1.442695, %v24_v1  ;;  %s70_s11 = sshll.u32 %s147_s0, 4  ;;  %s71_s11 = int_to_ptr.vmem [resolvable:$true] %s70_s11 }
   0x8   :  { %86 = vpow2.f32 %v82_v2 }
   0x9   :  { %88 = vpow2.f32 %v83_v3 }
   0xe   :  { %v87_v4 = vpop.eup %86 }
   0xf   :  { %v89_v5 = vpop.eup %88  ;;  %v31_v6 = vadd.f32 1.0, %v87_v4 }
  0x10   :  { %v32_v7 = vadd.f32 1.0, %v89_v5 }
  0x11   :  { %90 = vrcp.f32 %v31_v6  ;;  %vm38_vm0 = vweird.f32 %v31_v6  ;;  %v44_v11 = vand.u32 2147483648, %v31_v6  ;;  %v42_v14 = vand.u32 2147483647, %v31_v6 }
  0x12   :  { %92 = vrcp.f32 %v32_v7  ;;  %v59_v15 = vand.u32 2147483648, %v32_v7  ;;  %vm53_vm2 = vweird.f32 %v32_v7  ;;  %v57_v17 = vand.u32 2147483647, %v32_v7 }
  0x13   :  { %v45_v19 = vor.u32 1.1754944e-38, %v44_v11  ;;  %vm43_vm5 = vcmp.eq.f32.partialorder %v42_v14, 8.507059e+37 }
  0x14   :  { %v60_v22 = vor.u32 1.1754944e-38, %v59_v15  ;;  %vm58_vm7 = vcmp.eq.f32.partialorder %v57_v17, 8.507059e+37 }
  0x17   :  { %v91_v8 = vpop.eup %90 }
  0x18   :  { %v93_v9 = vpop.eup %92  ;;  %v34_v10 = vmul.f32 %v91_v8, %v31_v6  ;;  %vm39_vm1 = vweird.f32 %v91_v8 }
  0x19   :  { %v49_v12 = vmul.f32 %v93_v9, %v32_v7  ;;  %vm54_vm3 = vweird.f32 %v93_v9  ;;  %vm40_vm4 = vmor %vm38_vm0, %vm39_vm1 }
  0x1a   :  { %v35_v13 = vsub.f32 1.0, %v34_v10  ;;  %vm55_vm6 = vmor %vm53_vm2, %vm54_vm3 }
  0x1b   :  { %v50_v16 = vsub.f32 1.0, %v49_v12 }
  0x1c   :  { %v36_v18 = vmul.f32 %v91_v8, %v35_v13 }
  0x1d   :  { %v51_v20 = vmul.f32 %v93_v9, %v50_v16 }
  0x1e   :  { %v37_v21 = vadd.f32 %v91_v8, %v36_v18 }
  0x1f   :  { %v52_v23 = vadd.f32 %v93_v9, %v51_v20 }
  0x20   :  { %v41_v24 = vsel %vm40_vm4, %v91_v8, %v37_v21 }
  0x21   :  { %v46_v25 = vsel %vm43_vm5, %v45_v19, %v41_v24  ;;  %v56_v26 = vsel %vm55_vm6, %v93_v9, %v52_v23 }
  0x22   :  { %63 = vst [vmem:[#allocation5] sm:$0xff] %v46_v25  ;;  %v61_v27 = vsel %vm58_vm7, %v60_v22, %v56_v26 }
  0x23   :  { %64 = vst [vmem:[#allocation5 + $0x8] sm:$0xff] %v61_v27 }
  0x24   :  { %75 = dma.vmem_to_hbm [thread:$0]  %s71_s11, 256, %s73_s14, [#allocation4]  }
  0x25   :  { %144 = dma.done.wait [#allocation4], 256  }
  0x26   :  { %145 = vsyncadd [#allocation4], 4294967040 }
  0x27   :  { %80 = vsyncpa [#allocation3], 1 }
  0x28   :  { %81 = vsyncpa [#allocation4], 1 }

</bundles_post_ra>
